<compile_context>
chip_gen: v7x
topology: tpu7x:2x2x1
jax: 0.10.0
libtpu: 0.0.40
codegen_flags: <defaults>
</compile_context>

<pallas_src>
import functools

import numpy as np
import jax
import jax.numpy as jnp
from jax import lax
from jax.experimental import pallas as pl
from jax.experimental.pallas import tpu as pltpu


def _round_up(n, m):
    return ((n + m - 1) // m) * m


def _mlp_kernel(x_ref, w_in_ref, b_in_ref, w_h_ref, b_h_ref,
                w_out_ref, b_out_ref, o_ref, h_ref, *, depth):
    # First Linear (no activation).  bf16 MXU inputs, f32 accumulation.
    x_bf = x_ref[...].astype(jnp.bfloat16)
    h0 = jnp.dot(x_bf, w_in_ref[...], preferred_element_type=jnp.float32)
    h_ref[...] = h0 + b_in_ref[...]

    # MLP_Block: depth x (Linear + Tanh), activation staged in VMEM scratch.
    def hidden_layer(d, carry):
        h = h_ref[...]
        pre = jnp.dot(h.astype(jnp.bfloat16), w_h_ref[d],
                      preferred_element_type=jnp.float32) + b_h_ref[d]
        h_ref[...] = jnp.tanh(pre)
        return carry

    if depth <= 4:
        for d in range(depth):          # small depth: static unroll
            hidden_layer(d, 0)
    else:                               # deep stacks: bounded code size / live ranges
        lax.fori_loop(0, depth, hidden_layer, 0)

    # Output Linear (no activation); lane-dense (padded) store.
    out = jnp.dot(h_ref[...].astype(jnp.bfloat16), w_out_ref[...],
                  preferred_element_type=jnp.float32) + b_out_ref[...]
    o_ref[...] = out.astype(o_ref.dtype)


def mlp_pallas(x2d, w_in, b_in, w_h, b_h, w_out, b_out, *, tm=512):
    """Fused MLP on a (M, F_in) matrix. Tiles over rows; weights stay resident in VMEM."""
    M, F_in = x2d.shape
    H = w_in.shape[1]
    F_out = w_out.shape[1]
    depth = w_h.shape[0]

    # Lane-dense padding of feature dims (exact: zero pads).
    F_in_p = _round_up(F_in, 128)
    H_p = _round_up(H, 128)
    F_out_p = _round_up(F_out, 128)

    # Row tile: big enough to fill the MXU, but never over-pad tiny inputs.
    tm_eff = min(tm, _round_up(M, 8))
    M_pad = _round_up(M, tm_eff)

    x_p = jnp.pad(x2d, ((0, M_pad - M), (0, F_in_p - F_in)))

    # Weights -> bf16 (MXU inputs), biases stay f32 for the f32 bias add.
    w_in_p = jnp.pad(w_in, ((0, F_in_p - F_in), (0, H_p - H))).astype(jnp.bfloat16)
    b_in_p = jnp.pad(b_in, ((0, 0), (0, H_p - H))).astype(jnp.float32)
    w_h_p = jnp.pad(w_h, ((0, 0), (0, H_p - H), (0, H_p - H))).astype(jnp.bfloat16)
    b_h_p = jnp.pad(b_h, ((0, 0), (0, 0), (0, H_p - H))).astype(jnp.float32)
    w_out_p = jnp.pad(w_out, ((0, H_p - H), (0, F_out_p - F_out))).astype(jnp.bfloat16)
    b_out_p = jnp.pad(b_out, ((0, 0), (0, F_out_p - F_out))).astype(jnp.float32)

    out = pl.pallas_call(
        functools.partial(_mlp_kernel, depth=depth),
        out_shape=jax.ShapeDtypeStruct((M_pad, F_out_p), x2d.dtype),
        grid_spec=pltpu.PrefetchScalarGridSpec(
            num_scalar_prefetch=0,
            grid=(M_pad // tm_eff,),
            in_specs=[
                pl.BlockSpec((tm_eff, F_in_p), lambda i: (i, 0)),        # activation row tile
                pl.BlockSpec((F_in_p, H_p), lambda i: (0, 0)),           # W_in (resident)
                pl.BlockSpec((1, H_p), lambda i: (0, 0)),                # b_in
                pl.BlockSpec((depth, H_p, H_p), lambda i: (0, 0, 0)),    # hidden weights (resident)
                pl.BlockSpec((depth, 1, H_p), lambda i: (0, 0, 0)),      # hidden biases
                pl.BlockSpec((H_p, F_out_p), lambda i: (0, 0)),          # W_out (resident)
                pl.BlockSpec((1, F_out_p), lambda i: (0, 0)),            # b_out
            ],
            out_specs=pl.BlockSpec((tm_eff, F_out_p), lambda i: (i, 0)),
            scratch_shapes=[pltpu.VMEM((tm_eff, H_p), jnp.float32)],     # staged activation h
        ),
        compiler_params=pltpu.CompilerParams(
            dimension_semantics=("parallel",),        # row grid shards across TCs on v7x
            vmem_limit_bytes=48 * 1024 * 1024,        # fits v7x's 64 MiB; unlocks big tiles
        ),
    )(x_p, w_in_p, b_in_p, w_h_p, b_h_p, w_out_p, b_out_p)
    return out[:M, :F_out]


if __name__ == "__main__":
    # Small shapes consistent with the module's forward: (c, v, x, y, z)
    input_shape = (2, 3, 5, 4, 4)
    output_shape = (2, 2, 5, 4, 2)   # x-dim (index 2) must match input's x-dim
    hidden_factor = 1
    depth = 1
    batch = 2

    c, v, X, y, z = input_shape
    co, vo, Xo, yo, zo = output_shape
    input_len = c * v * y * z        # 96  (prod of input_shape[:2] + input_shape[3:])
    output_len = co * vo * yo * zo   # 32
    hidden = int(input_len * hidden_factor)

    key = jax.random.PRNGKey(0)
    keys = jax.random.split(key, 8)

    def linear_init(kw, kb, fan_in, fan_out):
        # Mimic torch.nn.Linear default init: U(-1/sqrt(fan_in), 1/sqrt(fan_in))
        bound = 1.0 / np.sqrt(fan_in)
        w = jax.random.uniform(kw, (fan_in, fan_out), jnp.float32, -bound, bound)
        b = jax.random.uniform(kb, (1, fan_out), jnp.float32, -bound, bound)
        return w, b

    w_in, b_in = linear_init(keys[0], keys[1], input_len, hidden)
    whs, bhs = [], []
    for d in range(depth):
        wh, bh = linear_init(jax.random.fold_in(keys[2], d),
                             jax.random.fold_in(keys[3], d), hidden, hidden)
        whs.append(wh)
        bhs.append(bh)
    w_h = jnp.stack(whs)   # (depth, hidden, hidden)
    b_h = jnp.stack(bhs)   # (depth, 1, hidden)
    w_out, b_out = linear_init(keys[4], keys[5], hidden, output_len)

    x = jax.random.normal(keys[6], (batch, c, v, X, y, z), jnp.float32)

    # rearrange 'b c v x y z -> b x (c v y z)' then flatten (b, x) into rows
    x2d = jnp.transpose(x, (0, 3, 1, 2, 4, 5)).reshape(batch * X, input_len)

    out2d = mlp_pallas(x2d, w_in, b_in, w_h, b_h, w_out, b_out)

    # rearrange 'b x (c v y z) -> b c v x y z'
    out6 = out2d.reshape(batch, X, co, vo, yo, zo).transpose(0, 2, 3, 1, 4, 5)
    jax.block_until_ready(out6)

    # Pure-JAX f32 reference (kernel uses bf16 matmul inputs -> loosened tolerance)
    ref = x2d @ w_in + b_in
    for d in range(depth):
        ref = jnp.tanh(ref @ w_h[d] + b_h[d])
    ref = ref @ w_out + b_out
    ref6 = ref.reshape(batch, X, co, vo, yo, zo).transpose(0, 2, 3, 1, 4, 5)
    np.testing.assert_allclose(np.asarray(out6), np.asarray(ref6), rtol=2e-2, atol=2e-2)

    print("KERNEL_OK")
</pallas_src>

<mosaic_0001>
module attributes {stable_mosaic.version = 11 : i64} {
  func.func @_mlp_kernel(%arg0: i32, %arg1: memref<16x128xf32, #tpu.memory_space<vmem>>, %arg2: memref<128x128xbf16, #tpu.memory_space<vmem>>, %arg3: memref<1x128xf32, #tpu.memory_space<vmem>>, %arg4: memref<1x128x128xbf16, #tpu.memory_space<vmem>>, %arg5: memref<1x1x128xf32, #tpu.memory_space<vmem>>, %arg6: memref<128x128xbf16, #tpu.memory_space<vmem>>, %arg7: memref<1x128xf32, #tpu.memory_space<vmem>>, %arg8: memref<16x128xf32, #tpu.memory_space<vmem>>, %arg9: memref<16x128xf32, #tpu.memory_space<vmem>>) attributes {dimension_semantics = [#tpu.dimension_semantics<parallel>], iteration_bounds = array<i64: 1>, scalar_prefetch = 0 : i64, scratch_operands = 1 : i64, tpu.core_type = #tpu.core_type<tc>, window_params = [{transform_indices = @transform_0, window_bounds = array<i64: 16, 128>}, {pipeline_mode = #tpu.pipeline_mode<synchronous>, transform_indices = @transform_1, window_bounds = array<i64: 128, 128>}, {pipeline_mode = #tpu.pipeline_mode<synchronous>, transform_indices = @transform_2, window_bounds = array<i64: 1, 128>}, {pipeline_mode = #tpu.pipeline_mode<synchronous>, transform_indices = @transform_3, window_bounds = array<i64: 1, 128, 128>}, {pipeline_mode = #tpu.pipeline_mode<synchronous>, transform_indices = @transform_4, window_bounds = array<i64: 1, 1, 128>}, {pipeline_mode = #tpu.pipeline_mode<synchronous>, transform_indices = @transform_5, window_bounds = array<i64: 128, 128>}, {pipeline_mode = #tpu.pipeline_mode<synchronous>, transform_indices = @transform_6, window_bounds = array<i64: 1, 128>}, {transform_indices = @transform_7, window_bounds = array<i64: 16, 128>}]} {
    %c0 = arith.constant 0 : index
    %c0_0 = arith.constant 0 : index
    %0 = vector.load %arg1[%c0, %c0_0] : memref<16x128xf32, #tpu.memory_space<vmem>>, vector<16x128xf32>
    %1 = arith.truncf %0 : vector<16x128xf32> to vector<16x128xbf16>
    %c0_1 = arith.constant 0 : index
    %c0_2 = arith.constant 0 : index
    %2 = vector.load %arg2[%c0_1, %c0_2] : memref<128x128xbf16, #tpu.memory_space<vmem>>, vector<128x128xbf16>
    %cst = arith.constant dense<0.000000e+00> : vector<16x128xf32>
    %3 = tpu.matmul %1, %2, %cst {dimension_numbers = #tpu.dot_dimension_numbers<[1], [0], [0], [1], [0, 0, 1, 1], [], []>} : vector<16x128xbf16>, vector<128x128xbf16>, vector<16x128xf32> -> vector<16x128xf32>
    %c0_3 = arith.constant 0 : index
    %c0_4 = arith.constant 0 : index
    %4 = vector.load %arg3[%c0_3, %c0_4] : memref<1x128xf32, #tpu.memory_space<vmem>>, vector<1x128xf32>
    %5 = vector.broadcast %4 : vector<1x128xf32> to vector<16x128xf32>
    %6 = arith.addf %3, %5 : vector<16x128xf32>
    %c0_5 = arith.constant 0 : index
    %c0_6 = arith.constant 0 : index
    %7 = vector.load %arg9[%c0_5, %c0_6] : memref<16x128xf32, #tpu.memory_space<vmem>>, vector<16x128xf32>
    tpu.vector_store %arg9[%c0_5, %c0_6], %6 {strides = array<i32>} : memref<16x128xf32, #tpu.memory_space<vmem>>, vector<16x128xf32>,
    %c0_7 = arith.constant 0 : index
    %c0_8 = arith.constant 0 : index
    %8 = vector.load %arg9[%c0_7, %c0_8] : memref<16x128xf32, #tpu.memory_space<vmem>>, vector<16x128xf32>
    %9 = arith.truncf %8 : vector<16x128xf32> to vector<16x128xbf16>
    %c0_9 = arith.constant 0 : index
    %c0_10 = arith.constant 0 : index
    %c0_11 = arith.constant 0 : index
    %10 = vector.load %arg4[%c0_9, %c0_10, %c0_11] : memref<1x128x128xbf16, #tpu.memory_space<vmem>>, vector<1x128x128xbf16>
    %11 = vector.shape_cast %10 : vector<1x128x128xbf16> to vector<128x128xbf16>
    %cst_12 = arith.constant dense<0.000000e+00> : vector<16x128xf32>
    %12 = tpu.matmul %9, %11, %cst_12 {dimension_numbers = #tpu.dot_dimension_numbers<[1], [0], [0], [1], [0, 0, 1, 1], [], []>} : vector<16x128xbf16>, vector<128x128xbf16>, vector<16x128xf32> -> vector<16x128xf32>
    %c0_13 = arith.constant 0 : index
    %c0_14 = arith.constant 0 : index
    %c0_15 = arith.constant 0 : index
    %13 = vector.load %arg5[%c0_13, %c0_14, %c0_15] : memref<1x1x128xf32, #tpu.memory_space<vmem>>, vector<1x1x128xf32>
    %14 = vector.shape_cast %13 : vector<1x1x128xf32> to vector<1x128xf32>
    %15 = vector.broadcast %14 : vector<1x128xf32> to vector<16x128xf32>
    %16 = arith.addf %12, %15 : vector<16x128xf32>
    %17 = math.tanh %16 : vector<16x128xf32>
    %c0_16 = arith.constant 0 : index
    %c0_17 = arith.constant 0 : index
    %18 = vector.load %arg9[%c0_16, %c0_17] : memref<16x128xf32, #tpu.memory_space<vmem>>, vector<16x128xf32>
    tpu.vector_store %arg9[%c0_16, %c0_17], %17 {strides = array<i32>} : memref<16x128xf32, #tpu.memory_space<vmem>>, vector<16x128xf32>,
    %c0_18 = arith.constant 0 : index
    %c0_19 = arith.constant 0 : index
    %19 = vector.load %arg9[%c0_18, %c0_19] : memref<16x128xf32, #tpu.memory_space<vmem>>, vector<16x128xf32>
    %20 = arith.truncf %19 : vector<16x128xf32> to vector<16x128xbf16>
    %c0_20 = arith.constant 0 : index
    %c0_21 = arith.constant 0 : index
    %21 = vector.load %arg6[%c0_20, %c0_21] : memref<128x128xbf16, #tpu.memory_space<vmem>>, vector<128x128xbf16>
    %cst_22 = arith.constant dense<0.000000e+00> : vector<16x128xf32>
    %22 = tpu.matmul %20, %21, %cst_22 {dimension_numbers = #tpu.dot_dimension_numbers<[1], [0], [0], [1], [0, 0, 1, 1], [], []>} : vector<16x128xbf16>, vector<128x128xbf16>, vector<16x128xf32> -> vector<16x128xf32>
    %c0_23 = arith.constant 0 : index
    %c0_24 = arith.constant 0 : index
    %23 = vector.load %arg7[%c0_23, %c0_24] : memref<1x128xf32, #tpu.memory_space<vmem>>, vector<1x128xf32>
    %24 = vector.broadcast %23 : vector<1x128xf32> to vector<16x128xf32>
    %25 = arith.addf %22, %24 : vector<16x128xf32>
    %c0_25 = arith.constant 0 : index
    %c0_26 = arith.constant 0 : index
    %26 = vector.load %arg8[%c0_25, %c0_26] : memref<16x128xf32, #tpu.memory_space<vmem>>, vector<16x128xf32>
    tpu.vector_store %arg8[%c0_25, %c0_26], %25 {strides = array<i32>} : memref<16x128xf32, #tpu.memory_space<vmem>>, vector<16x128xf32>,
    return
  }
  func.func @transform_0(%arg0: i32) -> (i32, i32) {
    %c0_i32 = arith.constant 0 : i32
    %c0_i32_0 = arith.constant 0 : i32
    return %arg0, %c0_i32 : i32, i32
  }
  func.func @transform_1(%arg0: i32) -> (i32, i32) {
    %c0_i32 = arith.constant 0 : i32
    %c0_i32_0 = arith.constant 0 : i32
    %c0_i32_1 = arith.constant 0 : i32
    return %c0_i32, %c0_i32_0 : i32, i32
  }
  func.func @transform_2(%arg0: i32) -> (i32, i32) {
    %c0_i32 = arith.constant 0 : i32
    %c0_i32_0 = arith.constant 0 : i32
    %c0_i32_1 = arith.constant 0 : i32
    return %c0_i32, %c0_i32_0 : i32, i32
  }
  func.func @transform_3(%arg0: i32) -> (i32, i32, i32) {
    %c0_i32 = arith.constant 0 : i32
    %c0_i32_0 = arith.constant 0 : i32
    %c0_i32_1 = arith.constant 0 : i32
    %c0_i32_2 = arith.constant 0 : i32
    return %c0_i32, %c0_i32_0, %c0_i32_1 : i32, i32, i32
  }
  func.func @transform_4(%arg0: i32) -> (i32, i32, i32) {
    %c0_i32 = arith.constant 0 : i32
    %c0_i32_0 = arith.constant 0 : i32
    %c0_i32_1 = arith.constant 0 : i32
    %c0_i32_2 = arith.constant 0 : i32
    return %c0_i32, %c0_i32_0, %c0_i32_1 : i32, i32, i32
  }
  func.func @transform_5(%arg0: i32) -> (i32, i32) {
    %c0_i32 = arith.constant 0 : i32
    %c0_i32_0 = arith.constant 0 : i32
    %c0_i32_1 = arith.constant 0 : i32
    return %c0_i32, %c0_i32_0 : i32, i32
  }
  func.func @transform_6(%arg0: i32) -> (i32, i32) {
    %c0_i32 = arith.constant 0 : i32
    %c0_i32_0 = arith.constant 0 : i32
    %c0_i32_1 = arith.constant 0 : i32
    return %c0_i32, %c0_i32_0 : i32, i32
  }
  func.func @transform_7(%arg0: i32) -> (i32, i32) {
    %c0_i32 = arith.constant 0 : i32
    %c0_i32_0 = arith.constant 0 : i32
    return %arg0, %c0_i32 : i32, i32
  }
}

</mosaic_0001>

<bundles_post_ra>
// kernel: tpu_custom_call.1
= control target key start
LH: loop header
LB: loop body
LE: loop exit
PB: predicated region body
PF: predicated region fallthrough
CT: control target
= control target key end

     0   :  { %12 = vsyncpa [#allocation4], 0  ;;  %s898_s0 = inlined_call_operand.hbm [shape: f32[16,128], index: 0, kind: input, shape index: {}]   ;;  %s899_s1 = inlined_call_operand.hbm [shape: bf16[128,128], index: 1, kind: input, shape index: {}]   ;;  %s900_s2 = inlined_call_operand.vmem [shape: f32[1,128], index: 2, kind: input, shape index: {}]   ;;  %s901_s3 = inlined_call_operand.hbm [shape: bf16[1,128,128], index: 3, kind: input, shape index: {}]   ;;  %s902_s4 = inlined_call_operand.vmem [shape: f32[1,1,128], index: 4, kind: input, shape index: {}]   ;;  %s903_s5 = inlined_call_operand.hbm [shape: bf16[128,128], index: 5, kind: input, shape index: {}]   ;;  %s904_s6 = inlined_call_operand.vmem [shape: f32[1,128], index: 6, kind: input, shape index: {}]   ;;  %s905_s7 = inlined_call_operand.hbm [shape: f32[16,128], index: 7, kind: output, shape index: {}]  }
   0x1   :  { %13 = vsyncpa [#allocation7], 0 }
   0x2   :  { %14 = vsyncpa [#allocation10], 0 }
   0x3   :  { %15 = vsyncpa [#allocation5], 0  ;;  %s726_s24 = smov [#allocation6]   ;;  %s608_s28 = scalar_lea.hbm %s899_s1, 1024 }
   0x4   :  { %s33_s25 = sshll.u32 %s726_s24, 4  ;;  %p609_p0 = scmp.ne.s32.totalorder %s899_s1, %s608_s28  ;;  %s34_s25 = int_to_ptr.vmem [resolvable:$true] %s33_s25 }
   0x5   :  { %p612_p1 = scmp.lt.u32.totalorder %s608_s28, %s899_s1 }
   0x7   :  { %p614_p2 = pnand %p612_p1, %p609_p0 }
   0x9   :  { %617 = shalt.err (!%p614_p2)
}
   0xa   :  { %s618_s10 = scalar_lea.vmem %s34_s25, 1024  ;;  %p623_p4 = scmp.lt.s32.totalorder %s34_s25, %s34_s25 }
   0xb   :  { %p619_p3 = scmp.ne.s32.totalorder %s34_s25, %s618_s10  ;;  %p624_p5 = scmp.lt.s32.totalorder %s618_s10, %s618_s10 }
   0xd   :  { %p625_p6 = por %p624_p5, %p623_p4 }
   0xf   :  { %p626_p7 = pnand %p625_p6, %p619_p3 }
  0x11   :  { %629 = shalt.err (!%p626_p7)
}
  0x12   :  { %s727_s11 = smov 64   ;;  %s728_s12 = smov 4  }
  0x13   :  { %39 = dma.hbm_to_vmem [thread:$0]  %s899_s1, 1024, %s34_s25, [#allocation7], %s727_s11, %s727_s11, %s728_s12  }
  0x14   :  { %s729_s15 = smov [#allocation3]   ;;  %s630_s19 = scalar_lea.hbm %s898_s0, 256 }
  0x15   :  { %s21_s16 = sshll.u32 %s729_s15, 4  ;;  %p631_p8 = scmp.ne.s32.totalorder %s898_s0, %s630_s19  ;;  %s22_s16 = int_to_ptr.vmem [resolvable:$true] %s21_s16 }
  0x16   :  { %p634_p9 = scmp.lt.u32.totalorder %s630_s19, %s898_s0 }
  0x18   :  { %p636_p10 = pnand %p634_p9, %p631_p8 }
  0x1a   :  { %639 = shalt.err (!%p636_p10)
}
  0x1b   :  { %s640_s24 = scalar_lea.vmem %s22_s16, 256  ;;  %p645_p12 = scmp.lt.s32.totalorder %s22_s16, %s22_s16 }
  0x1c   :  { %p641_p11 = scmp.ne.s32.totalorder %s22_s16, %s640_s24  ;;  %p646_p13 = scmp.lt.s32.totalorder %s640_s24, %s640_s24 }
  0x1e   :  { %p647_p0 = por %p646_p13, %p645_p12 }
  0x20   :  { %p648_p1 = pnand %p647_p0, %p641_p11 }
  0x22   :  { %651 = shalt.err (!%p648_p1)
}
  0x23   :  { %s730_s1 = smov 128   ;;  %s731_s25 = smov 8  }
  0x24   :  { %27 = dma.hbm_to_vmem [thread:$0]  %s898_s0, 256, %s22_s16, [#allocation4], %s730_s1, %s730_s1, %s731_s25  }
  0x25   :  { %s732_s28 = smov [#allocation8]   ;;  %s733_s30 = smov [#allocation9]  }
  0x26   :  { %s47_s29 = sshll.u32 %s732_s28, 4  ;;  %s61_s8 = sshll.u32 %s733_s30, 4  ;;  %s48_s29 = int_to_ptr.vmem [resolvable:$true] %s47_s29  ;;  %s807_s8 = int_to_ptr.vmem [resolvable:$true] %s61_s8 }
  0x27   :  { %s652_s13 = scalar_lea.hbm %s901_s3, 1024 }
  0x28   :  { %p653_p2 = scmp.ne.s32.totalorder %s901_s3, %s652_s13  ;;  %p656_p3 = scmp.lt.u32.totalorder %s652_s13, %s901_s3 }
  0x2a   :  { %p658_p4 = pnand %p656_p3, %p653_p2 }
  0x2c   :  { %661 = shalt.err (!%p658_p4)
}
  0x2d   :  { %s662_s0 = scalar_lea.vmem %s48_s29, 1024  ;;  %p667_p6 = scmp.lt.s32.totalorder %s48_s29, %s48_s29 }
  0x2e   :  { %p663_p5 = scmp.ne.s32.totalorder %s48_s29, %s662_s0  ;;  %p668_p7 = scmp.lt.s32.totalorder %s662_s0, %s662_s0 }
  0x30   :  { %p669_p8 = por %p668_p7, %p667_p6 }
  0x32   :  { %p670_p9 = pnand %p669_p8, %p663_p5 }
  0x34   :  { %673 = shalt.err (!%p670_p9)
}
  0x35   :  { %53 = dma.hbm_to_vmem [thread:$0]  %s901_s3, 1024, %s48_s29, [#allocation7], %s727_s11, %s727_s11, %s728_s12  }
  0x36   :  { %s674_s22 = scalar_lea.hbm %s903_s5, 1024 }
  0x37   :  { %p675_p10 = scmp.ne.s32.totalorder %s903_s5, %s674_s22  ;;  %p678_p11 = scmp.lt.u32.totalorder %s674_s22, %s903_s5 }
  0x39   :  { %p680_p12 = pnand %p678_p11, %p675_p10 }
  0x3b   :  { %683 = shalt.err (!%p680_p12)
}
  0x3c   :  { %s684_s28 = scalar_lea.vmem %s807_s8, 1024  ;;  %p689_p0 = scmp.lt.s32.totalorder %s807_s8, %s807_s8 }
  0x3d   :  { %p685_p13 = scmp.ne.s32.totalorder %s807_s8, %s684_s28  ;;  %p690_p1 = scmp.lt.s32.totalorder %s684_s28, %s684_s28 }
  0x3f   :  { %p691_p2 = por %p690_p1, %p689_p0 }
  0x41   :  { %p692_p3 = pnand %p691_p2, %p685_p13 }
  0x43   :  { %695 = shalt.err (!%p692_p3)
}
  0x44   :  { %67 = dma.hbm_to_vmem [thread:$0]  %s903_s5, 1024, %s807_s8, [#allocation10], %s727_s11, %s727_s11, %s728_s12  }
  0x45   :  { %718 = dma.done.wait [#allocation4], 256  }
  0x46   :  { %719 = vsyncadd [#allocation4], 4294967040 }
  0x47   :  { %720 = dma.done.wait [#allocation7], 2048  }
  0x48   :  { %721 = vsyncadd [#allocation7], 4294965248 }
  0x49   :  { %722 = dma.done.wait [#allocation10], 1024  }
  0x4a   :  { %723 = vsyncadd [#allocation10], 4294966272  ;;  %v734_v0 = vmov 0.0   ;;  %vm735_vm0 = vmmov 0   ;;  %v580_v1 = vld [vmem:[#allocation6] sm:$0xff]   ;;  %v581_v2 = vld [vmem:[#allocation6 + $0x8] sm:$0xff]  }
  0x4b   :  { %509 = vmatprep.subr.bf16.mxu0 %v734_v0  ;;  %525 = vmatprep.mubr.msk.bf16.mxu0 %vm735_vm0, %v734_v0  ;;  %v582_v3 = vld [vmem:[#allocation6 + $0x10] sm:$0xff]   ;;  %v588_v4 = vld [vmem:[#allocation8] sm:$0xff]   ;;  %v583_v5 = vld [vmem:[#allocation6 + $0x18] sm:$0xff]   ;;  %s736_s9 = smov [#allocation11]  }
  0x4c   :  { %529 = vmatprep.subr.bf16.mxu1 %v734_v0  ;;  %545 = vmatprep.mubr.msk.bf16.mxu1 %vm735_vm0, %v734_v0  ;;  %v589_v6 = vld [vmem:[#allocation8 + $0x8] sm:$0xff]   ;;  %v584_v7 = vld [vmem:[#allocation6 + $0x20] sm:$0xff]   ;;  %v590_v8 = vld [vmem:[#allocation8 + $0x10] sm:$0xff]   ;;  %s441_s10 = sshll.u32 %s736_s9, 4  ;;  %s442_s10 = int_to_ptr.vmem [resolvable:$true] %s441_s10 }
  0x4d   :  { %510 = vmatpush3.bf16.msra.mxu0 %v580_v1  ;;  %530 = vmatpush3.bf16.msra.mxu1 %v588_v4  ;;  %v585_v9 = vld [vmem:[#allocation6 + $0x28] sm:$0xff]   ;;  %v591_v10 = vld [vmem:[#allocation8 + $0x18] sm:$0xff]   ;;  %v586_v11 = vld [vmem:[#allocation6 + $0x30] sm:$0xff]   ;;  %p701_p5 = scmp.lt.s32.totalorder %s442_s10, %s442_s10 }
  0x4e   :  { %511 = vmatprep.subr.bf16.mxu0 %v734_v0  ;;  %531 = vmatprep.subr.bf16.mxu1 %v734_v0  ;;  %v592_v12 = vld [vmem:[#allocation8 + $0x20] sm:$0xff]   ;;  %v587_v13 = vld [vmem:[#allocation6 + $0x38] sm:$0xff]   ;;  %v83_v14 = vld [vmem:[#allocation3] sm:$0xff] }
  0x4f   :  { %v84_v15 = vld [vmem:[#allocation3 + $0x8] sm:$0xff]  ;;  %v593_v16 = vld [vmem:[#allocation8 + $0x28] sm:$0xff]   ;;  %v594_v18 = vld [vmem:[#allocation8 + $0x30] sm:$0xff]  }
  0x50   :  { %v85_v17 = vpack.c.bf16 %v84_v15, %v83_v14  ;;  %v595_v19 = vld [vmem:[#allocation8 + $0x38] sm:$0xff]   ;;  %v596_v20 = vld [vmem:[#allocation9] sm:$0xff]   ;;  %v597_v21 = vld [vmem:[#allocation9 + $0x8] sm:$0xff]  }
  0x51   :  { %512 = vmatpush3.bf16.msra.mxu0 %v581_v2  ;;  %532 = vmatpush3.bf16.msra.mxu1 %v589_v6  ;;  %v598_v22 = vld [vmem:[#allocation9 + $0x10] sm:$0xff]   ;;  %v599_v23 = vld [vmem:[#allocation9 + $0x18] sm:$0xff]   ;;  %v600_v32 = vld [vmem:[#allocation9 + $0x20] sm:$0xff]  }
  0x52   :  { %513 = vmatprep.subr.bf16.mxu0 %v734_v0  ;;  %533 = vmatprep.subr.bf16.mxu1 %v734_v0  ;;  %v455_v24 = vld [vmem:[%s900_s2] ss:$0 sm:$0xff]  ;;  %v601_v33 = vld [vmem:[#allocation9 + $0x28] sm:$0xff]   ;;  %v603_v35 = vld [vmem:[#allocation9 + $0x38] sm:$0xff]  }
  0x53   :  { %v602_v34 = vld [vmem:[#allocation9 + $0x30] sm:$0xff]  }
  0x54   :  { %v464_v36 = vld [vmem:[%s902_s4] ss:$0 sm:$0xff]  ;;  %s696_s4 = scalar_lea.vmem %s442_s10, 256 }
  0x55   :  { %514 = vmatpush3.bf16.msra.mxu0 %v582_v3  ;;  %534 = vmatpush3.bf16.msra.mxu1 %v590_v8  ;;  %v473_v46 = vld [vmem:[%s904_s6] ss:$0 sm:$0xff]  ;;  %p697_p4 = scmp.ne.s32.totalorder %s442_s10, %s696_s4  ;;  %p702_p6 = scmp.lt.s32.totalorder %s696_s4, %s696_s4 }
  0x56   :  { %515 = vmatprep.subr.bf16.mxu0 %v734_v0  ;;  %535 = vmatprep.subr.bf16.mxu1 %v734_v0 }
  0x57   :  { %p703_p7 = por %p702_p6, %p701_p5 }
  0x59   :  { %516 = vmatpush3.bf16.msra.mxu0 %v583_v5  ;;  %536 = vmatpush3.bf16.msra.mxu1 %v591_v10  ;;  %p704_p8 = pnand %p703_p7, %p697_p4 }
  0x5a   :  { %517 = vmatprep.subr.bf16.mxu0 %v734_v0  ;;  %537 = vmatprep.subr.bf16.mxu1 %v734_v0 }
  0x5d   :  { %518 = vmatpush3.bf16.msra.mxu0 %v584_v7  ;;  %538 = vmatpush3.bf16.msra.mxu1 %v592_v12 }
  0x5e   :  { %519 = vmatprep.subr.bf16.mxu0 %v734_v0  ;;  %539 = vmatprep.subr.bf16.mxu1 %v734_v0 }
  0x61   :  { %520 = vmatpush3.bf16.msra.mxu0 %v585_v9  ;;  %540 = vmatpush3.bf16.msra.mxu1 %v593_v16 }
  0x62   :  { %521 = vmatprep.subr.bf16.mxu0 %v734_v0  ;;  %541 = vmatprep.subr.bf16.mxu1 %v734_v0 }
  0x65   :  { %522 = vmatpush3.bf16.msra.mxu0 %v586_v11  ;;  %542 = vmatpush3.bf16.msra.mxu1 %v594_v18 }
  0x66   :  { %523 = vmatprep.subr.bf16.mxu0 %v734_v0  ;;  %543 = vmatprep.subr.bf16.mxu1 %v734_v0 }
  0x69   :  { %524 = vmatpush3.bf16.msra.mxu0 %v587_v13  ;;  %544 = vmatpush3.bf16.msra.mxu1 %v595_v19 }
  0x6a   :  { %549 = vmatprep.subr.bf16.mxu0 %v734_v0 }
  0x6c   :  { %526 = vmatmul.mubr.bf16.vlgmr.msra.gmra.mrb[0].mxu0 %v85_v17 }
  0x6d   :  { %565 = vmatprep.mubr.msk.bf16.mxu0 %vm735_vm0, %v734_v0  ;;  %550 = vmatpush3.bf16.msra.mxu0 %v596_v20 }
  0x6e   :  { %551 = vmatprep.subr.bf16.mxu0 %v734_v0 }
  0x71   :  { %552 = vmatpush3.bf16.msra.mxu0 %v597_v21 }
  0x72   :  { %553 = vmatprep.subr.bf16.mxu0 %v734_v0 }
  0x75   :  { %554 = vmatpush3.bf16.msra.mxu0 %v598_v22 }
  0x76   :  { %555 = vmatprep.subr.bf16.mxu0 %v734_v0 }
  0x79   :  { %556 = vmatpush3.bf16.msra.mxu0 %v599_v23 }
  0x7a   :  { %557 = vmatprep.subr.bf16.mxu0 %v734_v0 }
  0x7d   :  { %558 = vmatpush3.bf16.msra.mxu0 %v600_v32 }
  0x7e   :  { %559 = vmatprep.subr.bf16.mxu0 %v734_v0 }
  0x81   :  { %560 = vmatpush3.bf16.msra.mxu0 %v601_v33 }
  0x82   :  { %561 = vmatprep.subr.bf16.mxu0 %v734_v0 }
  0x85   :  { %562 = vmatpush3.bf16.msra.mxu0 %v602_v34 }
  0x86   :  { %563 = vmatprep.subr.bf16.mxu0 %v734_v0 }
  0x89   :  { %564 = vmatpush3.bf16.msra.mxu0 %v603_v35 }
 0x13f   :  { %v191_v25 = vpop.f32.mrb[0].mxu0 }
 0x140   :  { %v527_v26 = vpop.f32.mrb[1].mxu0  ;;  %v192_v28 = vadd.f32 %v455_v24, %v191_v25 }
 0x141   :  { %v194_v27 = vpop.f32.mrb[2].mxu0 }
 0x142   :  { %v195_v29 = vadd.f32 %v455_v24, %v194_v27  ;;  %v528_v30 = vpop.f32.mrb[3].mxu0 }
 0x144   :  { %v202_v31 = vpack.c.bf16 %v195_v29, %v192_v28 }
 0x146   :  { %546 = vmatmul.mubr.bf16.vlgmr.msra.gmra.mrb[0].mxu1 %v202_v31 }
 0x219   :  { %v308_v37 = vpop.f32.mrb[0].mxu1 }
 0x21a   :  { %v309_v38 = vadd.f32 %v464_v36, %v308_v37  ;;  %v547_v39 = vpop.f32.mrb[1].mxu1 }
 0x21b   :  { %v311_v40 = vpop.f32.mrb[2].mxu1 }
 0x21c   :  { %v312_v41 = vadd.f32 %v464_v36, %v311_v40  ;;  %v548_v42 = vpop.f32.mrb[3].mxu1  ;;  %604 = vtanh.f32 %v309_v38 }
 0x21e   :  { %606 = vtanh.f32 %v312_v41 }
 0x226   :  { %v605_v43 = vpop.eup %604 }
 0x228   :  { %v607_v44 = vpop.eup %606 }
 0x229   :  { %v321_v45 = vpack.c.bf16 %v607_v44, %v605_v43 }
 0x22b   :  { %566 = vmatmul.mubr.bf16.vlgmr.msra.gmra.mrb[4].mxu0 %v321_v45 }
 0x2fe   :  { %v427_v47 = vpop.f32.mrb[4].mxu0 }
 0x2ff   :  { %v428_v48 = vadd.f32 %v473_v46, %v427_v47  ;;  %v567_v49 = vpop.f32.mrb[5].mxu0 }
 0x300   :  { %v430_v50 = vpop.f32.mrb[6].mxu0 }
 0x301   :  { %434 = vst [vmem:[#allocation11] sm:$0xff] %v428_v48  ;;  %v431_v51 = vadd.f32 %v473_v46, %v430_v50  ;;  %v568_v52 = vpop.f32.mrb[7].mxu0 }
 0x303   :  { %435 = vst [vmem:[#allocation11 + $0x8] sm:$0xff] %v431_v51 }
 0x304   :  { %707 = shalt.err (!%p704_p8)
}
 0x305   :  { %s708_s14 = scalar_lea.hbm %s905_s7, 256 }
 0x306   :  { %p709_p9 = scmp.ne.s32.totalorder %s905_s7, %s708_s14  ;;  %p712_p10 = scmp.lt.u32.totalorder %s708_s14, %s905_s7 }
 0x308   :  { %p714_p11 = pnand %p712_p10, %p709_p9 }
 0x30a   :  { %717 = shalt.err (!%p714_p11)
}
 0x30b   :  { %447 = dma.vmem_to_hbm [thread:$0]  %s442_s10, 256, %s905_s7, [#allocation5], %s730_s1, %s730_s1, %s731_s25  }
 0x30c   :  { %724 = dma.done.wait [#allocation5], 256  }
 0x30d   :  { %725 = vsyncadd [#allocation5], 4294967040 }
 0x30e   :  { %451 = vsyncpa [#allocation4], 1 }
 0x30f   :  { %452 = vsyncpa [#allocation7], 1 }
 0x310   :  { %453 = vsyncpa [#allocation10], 1 }
 0x311   :  { %454 = vsyncpa [#allocation5], 1 }

</bundles_post_ra>
